<compile_context>
chip_gen: v5e
topology: v5e:2x2
jax: 0.10.0
libtpu: 0.0.40
codegen_flags: <defaults>
</compile_context>

<pallas_src>
import functools

import jax
import jax.numpy as jnp
from jax.experimental import pallas as pl
from jax.experimental.pallas import tpu as pltpu

BN_EPS = 1e-5
LANE = 128            # feature (lane) padding for weight N / output
SUB = 8               # sublane granularity for the batch dimension
MAX_BATCH_TILE = 256  # batch tile when gridding over large batches


def _ceil_to(x, m):
    return (x + m - 1) // m * m


# ----------------------------- Pallas kernel --------------------------------
def pw_mlp2_kernel(x_ref, w_ref, b_ref, o_ref, *, k_pad):
    """4 serially-dependent MXU matmuls + 3 ReLUs + 4 bias adds.

    x_ref: (TB, k_pad)      input tile (compute dtype: f32 or bf16)
    w_ref: (4, k_pad, 128)  stacked folded weights [W_A, W_B, W_C, W_D]
    b_ref: (4, 1, 128)      stacked folded biases  [b_A, b_B, b_C, b_D] (f32)
    o_ref: (TB, 128)        f32 output tile (lane-dense store)
    """
    cdt = w_ref.dtype

    h = jnp.dot(x_ref[...], w_ref[0], preferred_element_type=jnp.float32) + b_ref[0]
    h = jnp.maximum(h, 0.0)
    h = jnp.dot(h[:, :k_pad].astype(cdt), w_ref[1], preferred_element_type=jnp.float32) + b_ref[1]
    h = jnp.maximum(h, 0.0)
    h = jnp.dot(h[:, :k_pad].astype(cdt), w_ref[2], preferred_element_type=jnp.float32) + b_ref[2]
    h = jnp.maximum(h, 0.0)
    o_ref[...] = (
        jnp.dot(h[:, :k_pad].astype(cdt), w_ref[3], preferred_element_type=jnp.float32) + b_ref[3]
    )
    # TODO(synk): dropout layers are identity here (module evaluated with training=False).


# ------------------------------ host-side prep --------------------------------
def _pad2(x, rows, cols):
    out = jnp.zeros((rows, cols), jnp.float32)
    return out.at[: x.shape[0], : x.shape[1]].set(x.astype(jnp.float32))


def dense_sparse_masked_weight(sparse_mask, weight, in_features, out_features):
    """Dense equivalent of SparseMaskedLinear_v2: scatter-add weight[k] into W[src_k, dst_k]."""
    w = jnp.zeros((in_features, out_features), jnp.float32)
    return w.at[sparse_mask[:, 0], sparse_mask[:, 1]].add(weight.astype(jnp.float32))


def bn_affine(gamma, beta, mean, var):
    scale = gamma.astype(jnp.float32) * jax.lax.rsqrt(var.astype(jnp.float32) + BN_EPS)
    shift = beta.astype(jnp.float32) - mean.astype(jnp.float32) * scale
    return scale, shift


def pack_params(sparse_mask, params, in_mask_f, out_mask_f, h1_f, h2_f, out_f,
                dtype=jnp.float32):
    """One-time host prep: dense-ify the sparse layer, fold BN + the affine-only chain,
    pack everything into one (4, K_pad, 128) weight stack and one (4, 1, 128) bias stack."""
    # The module applies sparse_masked twice; the 2nd application reads an out_mask_f-wide
    # tensor, so its source indices must be < out_mask_f (PyTorch would error, JAX scatter
    # would silently clamp — assert explicitly).
    src_max = int(jnp.max(sparse_mask[:, 0]))
    dst_max = int(jnp.max(sparse_mask[:, 1]))
    assert src_max < in_mask_f, "sparse_mask src index out of range for first application"
    assert dst_max < out_mask_f, "sparse_mask dst index out of range"
    assert src_max < out_mask_f, "second sparse_masked application needs src idx < out_mask_f"

    w_sm_a = dense_sparse_masked_weight(sparse_mask, params["sm_weight"], in_mask_f, out_mask_f)
    w_sm_b = dense_sparse_masked_weight(sparse_mask, params["sm_weight"], out_mask_f, out_mask_f)
    b_sm = params["sm_bias"].astype(jnp.float32)

    s1, t1 = bn_affine(params["bn1_gamma"], params["bn1_beta"], params["bn1_mean"], params["bn1_var"])
    s2, t2 = bn_affine(params["bn2_gamma"], params["bn2_beta"], params["bn2_mean"], params["bn2_var"])
    s3, t3 = bn_affine(params["bn3_gamma"], params["bn3_beta"], params["bn3_mean"], params["bn3_var"])

    W1 = params["W1"].astype(jnp.float32)
    W2 = params["W2"].astype(jnp.float32)
    W3 = params["W3"].astype(jnp.float32)
    b1 = params["b1"].astype(jnp.float32)
    b2 = params["b2"].astype(jnp.float32)
    b3 = params["b3"].astype(jnp.float32)

    # Layer A: relu(x @ Wsma + b_sm)
    W_A, b_A = w_sm_a, b_sm
    # Layer B: fold bn1 -> sparse_masked -> bn1 -> lin1 into ONE matmul:
    #   relu( h0 @ diag(s1)·Wsmb·diag(s1)·W1 + ((t1@Wsmb + b_sm)*s1 + t1)@W1 + b1 )
    W_B = (s1[:, None] * w_sm_b) @ (s1[:, None] * W1)
    b_B = ((t1 @ w_sm_b + b_sm) * s1 + t1) @ W1 + b1
    # Layer C: fold bn2 into lin2:  relu( h @ diag(s2)·W2 + t2@W2 + b2 )
    W_C = s2[:, None] * W2
    b_C = t2 @ W2 + b2
    # Layer D: fold bn3 into lin3:  h @ diag(s3)·W3 + t3@W3 + b3
    W_D = s3[:, None] * W3
    b_D = t3 @ W3 + b3

    # K padded only to 8 sublanes (shared across layers); N padded to 128 lanes.
    k_pad = _ceil_to(max(in_mask_f, out_mask_f, h1_f, h2_f), SUB)
    w_pack = jnp.stack(
        [_pad2(W_A, k_pad, LANE), _pad2(W_B, k_pad, LANE),
         _pad2(W_C, k_pad, LANE), _pad2(W_D, k_pad, LANE)],
        axis=0,
    ).astype(dtype)

    b_pack = jnp.zeros((4, 1, LANE), jnp.float32)
    for i, r in enumerate([b_A, b_B, b_C, b_D]):
        b_pack = b_pack.at[i, 0, : r.shape[0]].set(r)

    return w_pack, b_pack


# ------------------------------ jitted forward --------------------------------
@functools.partial(jax.jit, static_argnames=("out_f",))
def pw_mlp2_forward(x, w_pack, b_pack, out_f):
    b, in_f = x.shape
    k_pad = w_pack.shape[1]

    bp = _ceil_to(max(b, SUB), SUB)
    if bp > MAX_BATCH_TILE:
        tb = MAX_BATCH_TILE
        bp = _ceil_to(bp, tb)
    else:
        tb = bp

    # Single fused pad: batch -> multiple of 8 (or tile), lanes -> K_pad.
    x_pad = jnp.pad(x.astype(w_pack.dtype), ((0, bp - b), (0, k_pad - in_f)))

    out_pad = pl.pallas_call(
        functools.partial(pw_mlp2_kernel, k_pad=k_pad),
        out_shape=jax.ShapeDtypeStruct((bp, LANE), jnp.float32),
        grid=(bp // tb,),
        in_specs=[
            pl.BlockSpec((tb, k_pad), lambda i: (i, 0)),          # x: tiled over batch
            pl.BlockSpec((4, k_pad, LANE), lambda i: (0, 0, 0)),  # weights: VMEM-resident
            pl.BlockSpec((4, 1, LANE), lambda i: (0, 0, 0)),      # biases: VMEM-resident
        ],
        out_specs=pl.BlockSpec((tb, LANE), lambda i: (i, 0)),
        compiler_params=pltpu.CompilerParams(dimension_semantics=("parallel",)),
    )(x_pad, w_pack, b_pack)

    return out_pad[:b, :out_f]


# --------------------------- pure-JAX reference -------------------------------
def sparse_masked_linear_ref(x, sparse_mask, weight, bias, out_features):
    x_sel = x[:, sparse_mask[:, 0]]
    src = x_sel * weight[None, :]
    out = jnp.zeros((x.shape[0], out_features), x.dtype)
    out = out.at[:, sparse_mask[:, 1]].add(src)   # scatter_add along last dim
    return out + bias


def bn_eval_ref(x, gamma, beta, mean, var):
    return (x - mean) / jnp.sqrt(var + BN_EPS) * gamma + beta


def pw_mlp2_reference(x, sparse_mask, params, out_mask_f):
    p = params
    h = sparse_masked_linear_ref(x, sparse_mask, p["sm_weight"], p["sm_bias"], out_mask_f)
    h = jnp.maximum(h, 0.0)
    h = bn_eval_ref(h, p["bn1_gamma"], p["bn1_beta"], p["bn1_mean"], p["bn1_var"])
    h = sparse_masked_linear_ref(h, sparse_mask, p["sm_weight"], p["sm_bias"], out_mask_f)
    h = bn_eval_ref(h, p["bn1_gamma"], p["bn1_beta"], p["bn1_mean"], p["bn1_var"])
    h = jnp.maximum(h @ p["W1"] + p["b1"], 0.0)
    h = bn_eval_ref(h, p["bn2_gamma"], p["bn2_beta"], p["bn2_mean"], p["bn2_var"])
    h = jnp.maximum(h @ p["W2"] + p["b2"], 0.0)
    h = bn_eval_ref(h, p["bn3_gamma"], p["bn3_beta"], p["bn3_mean"], p["bn3_var"])
    return h @ p["W3"] + p["b3"]


# ------------------------------------ main ------------------------------------
if __name__ == "__main__":
    # Small shapes consistent with pw_MLP2.__init__ (in_mask_f == out_mask_f so the
    # module's double application of sparse_masked is well-defined).
    B = 6
    IN_MASK_F = OUT_MASK_F = 32
    H1_F, H2_F, OUT_F = 32, 24, 4
    N_CONN = 96

    key = jax.random.PRNGKey(0)
    keys = jax.random.split(key, 20)

    sparse_mask = jnp.stack(
        [
            jax.random.randint(keys[0], (N_CONN,), 0, IN_MASK_F, dtype=jnp.int32),
            jax.random.randint(keys[1], (N_CONN,), 0, OUT_MASK_F, dtype=jnp.int32),
        ],
        axis=1,
    )  # [N_CONN, 2]

    params = {
        "sm_weight": jax.random.normal(keys[2], (N_CONN,), jnp.float32),
        "sm_bias": 0.1 * jax.random.normal(keys[3], (OUT_MASK_F,), jnp.float32),
        "W1": 0.1 * jax.random.normal(keys[4], (OUT_MASK_F, H1_F), jnp.float32),
        "b1": 0.1 * jax.random.normal(keys[5], (H1_F,), jnp.float32),
        "W2": 0.1 * jax.random.normal(keys[6], (H1_F, H2_F), jnp.float32),
        "b2": 0.1 * jax.random.normal(keys[7], (H2_F,), jnp.float32),
        "W3": 0.1 * jax.random.normal(keys[8], (H2_F, OUT_F), jnp.float32),
        "b3": 0.1 * jax.random.normal(keys[9], (OUT_F,), jnp.float32),
        "bn1_gamma": 1.0 + 0.1 * jax.random.normal(keys[10], (OUT_MASK_F,), jnp.float32),
        "bn1_beta": 0.1 * jax.random.normal(keys[11], (OUT_MASK_F,), jnp.float32),
        "bn1_mean": 0.1 * jax.random.normal(keys[12], (OUT_MASK_F,), jnp.float32),
        "bn1_var": 0.5 + jnp.abs(jax.random.normal(keys[13], (OUT_MASK_F,), jnp.float32)),
        "bn2_gamma": 1.0 + 0.1 * jax.random.normal(keys[14], (H1_F,), jnp.float32),
        "bn2_beta": 0.1 * jax.random.normal(keys[15], (H1_F,), jnp.float32),
        "bn2_mean": 0.1 * jax.random.normal(keys[16], (H1_F,), jnp.float32),
        "bn2_var": 0.5 + jnp.abs(jax.random.normal(keys[17], (H1_F,), jnp.float32)),
        "bn3_gamma": 1.0 + 0.1 * jax.random.normal(keys[18], (H2_F,), jnp.float32),
        "bn3_beta": jnp.zeros((H2_F,), jnp.float32),
        "bn3_mean": jnp.zeros((H2_F,), jnp.float32),
        "bn3_var": jnp.ones((H2_F,), jnp.float32),
    }

    x = jax.random.normal(keys[19], (B, IN_MASK_F), jnp.float32)

    ref = pw_mlp2_reference(x, sparse_mask, params, OUT_MASK_F)

    # f32 path (strict) and bf16 path (MXU-native, f32 accumulate, loosened tolerance).
    for dtype, atol, rtol in [(jnp.float32, 5e-4, 5e-4), (jnp.bfloat16, 5e-2, 5e-2)]:
        w_pack, b_pack = pack_params(
            sparse_mask, params, IN_MASK_F, OUT_MASK_F, H1_F, H2_F, OUT_F, dtype=dtype
        )
        w_pack, b_pack = jax.block_until_ready((w_pack, b_pack))

        out = pw_mlp2_forward(x, w_pack, b_pack, out_f=OUT_F)
        out = jax.block_until_ready(out)

        assert out.shape == (B, OUT_F)
        assert jnp.allclose(out, ref, atol=atol, rtol=rtol), (
            f"Pallas output mismatch vs reference (dtype={dtype.__name__})"
        )

    print("KERNEL_OK")
</pallas_src>

<mosaic_0001>
module attributes {stable_mosaic.version = 11 : i64} {
  func.func @pw_mlp2_kernel(%arg0: i32, %arg1: memref<8x32xf32, #tpu.memory_space<vmem>>, %arg2: memref<4x32x128xf32, #tpu.memory_space<vmem>>, %arg3: memref<4x1x128xf32, #tpu.memory_space<vmem>>, %arg4: memref<8x128xf32, #tpu.memory_space<vmem>>) attributes {dimension_semantics = [#tpu.dimension_semantics<parallel>], iteration_bounds = array<i64: 1>, scalar_prefetch = 0 : i64, scratch_operands = 0 : i64, tpu.core_type = #tpu.core_type<tc>, window_params = [{transform_indices = @transform_0, window_bounds = array<i64: 8, 32>}, {pipeline_mode = #tpu.pipeline_mode<synchronous>, transform_indices = @transform_1, window_bounds = array<i64: 4, 32, 128>}, {pipeline_mode = #tpu.pipeline_mode<synchronous>, transform_indices = @transform_2, window_bounds = array<i64: 4, 1, 128>}, {transform_indices = @transform_3, window_bounds = array<i64: 8, 128>}]} {
    %c0 = arith.constant 0 : index
    %c0_0 = arith.constant 0 : index
    %0 = vector.load %arg1[%c0, %c0_0] : memref<8x32xf32, #tpu.memory_space<vmem>>, vector<8x32xf32>
    %c0_1 = arith.constant 0 : index
    %c0_2 = arith.constant 0 : index
    %c0_3 = arith.constant 0 : index
    %1 = vector.load %arg2[%c0_1, %c0_2, %c0_3] : memref<4x32x128xf32, #tpu.memory_space<vmem>>, vector<1x32x128xf32>
    %2 = vector.shape_cast %1 : vector<1x32x128xf32> to vector<32x128xf32>
    %cst = arith.constant dense<0.000000e+00> : vector<8x128xf32>
    %3 = tpu.matmul %0, %2, %cst {dimension_numbers = #tpu.dot_dimension_numbers<[1], [0], [0], [1], [0, 0, 1, 1], [], []>} : vector<8x32xf32>, vector<32x128xf32>, vector<8x128xf32> -> vector<8x128xf32>
    %c0_4 = arith.constant 0 : index
    %c0_5 = arith.constant 0 : index
    %c0_6 = arith.constant 0 : index
    %4 = vector.load %arg3[%c0_4, %c0_5, %c0_6] : memref<4x1x128xf32, #tpu.memory_space<vmem>>, vector<1x1x128xf32>
    %5 = vector.shape_cast %4 : vector<1x1x128xf32> to vector<1x128xf32>
    %6 = vector.broadcast %5 : vector<1x128xf32> to vector<8x128xf32>
    %7 = arith.addf %3, %6 : vector<8x128xf32>
    %cst_7 = arith.constant 0.000000e+00 : f32
    %8 = vector.broadcast %cst_7 : f32 to vector<8x128xf32>
    %9 = arith.maximumf %7, %8 : vector<8x128xf32>
    %10 = vector.extract_strided_slice %9 {offsets = [0, 0], sizes = [8, 32], strides = [1, 1]} : vector<8x128xf32> to vector<8x32xf32>
    %c1 = arith.constant 1 : index
    %c0_8 = arith.constant 0 : index
    %c0_9 = arith.constant 0 : index
    %11 = vector.load %arg2[%c1, %c0_8, %c0_9] : memref<4x32x128xf32, #tpu.memory_space<vmem>>, vector<1x32x128xf32>
    %12 = vector.shape_cast %11 : vector<1x32x128xf32> to vector<32x128xf32>
    %cst_10 = arith.constant dense<0.000000e+00> : vector<8x128xf32>
    %13 = tpu.matmul %10, %12, %cst_10 {dimension_numbers = #tpu.dot_dimension_numbers<[1], [0], [0], [1], [0, 0, 1, 1], [], []>} : vector<8x32xf32>, vector<32x128xf32>, vector<8x128xf32> -> vector<8x128xf32>
    %c1_11 = arith.constant 1 : index
    %c0_12 = arith.constant 0 : index
    %c0_13 = arith.constant 0 : index
    %14 = vector.load %arg3[%c1_11, %c0_12, %c0_13] : memref<4x1x128xf32, #tpu.memory_space<vmem>>, vector<1x1x128xf32>
    %15 = vector.shape_cast %14 : vector<1x1x128xf32> to vector<1x128xf32>
    %16 = vector.broadcast %15 : vector<1x128xf32> to vector<8x128xf32>
    %17 = arith.addf %13, %16 : vector<8x128xf32>
    %cst_14 = arith.constant 0.000000e+00 : f32
    %18 = vector.broadcast %cst_14 : f32 to vector<8x128xf32>
    %19 = arith.maximumf %17, %18 : vector<8x128xf32>
    %20 = vector.extract_strided_slice %19 {offsets = [0, 0], sizes = [8, 32], strides = [1, 1]} : vector<8x128xf32> to vector<8x32xf32>
    %c2 = arith.constant 2 : index
    %c0_15 = arith.constant 0 : index
    %c0_16 = arith.constant 0 : index
    %21 = vector.load %arg2[%c2, %c0_15, %c0_16] : memref<4x32x128xf32, #tpu.memory_space<vmem>>, vector<1x32x128xf32>
    %22 = vector.shape_cast %21 : vector<1x32x128xf32> to vector<32x128xf32>
    %cst_17 = arith.constant dense<0.000000e+00> : vector<8x128xf32>
    %23 = tpu.matmul %20, %22, %cst_17 {dimension_numbers = #tpu.dot_dimension_numbers<[1], [0], [0], [1], [0, 0, 1, 1], [], []>} : vector<8x32xf32>, vector<32x128xf32>, vector<8x128xf32> -> vector<8x128xf32>
    %c2_18 = arith.constant 2 : index
    %c0_19 = arith.constant 0 : index
    %c0_20 = arith.constant 0 : index
    %24 = vector.load %arg3[%c2_18, %c0_19, %c0_20] : memref<4x1x128xf32, #tpu.memory_space<vmem>>, vector<1x1x128xf32>
    %25 = vector.shape_cast %24 : vector<1x1x128xf32> to vector<1x128xf32>
    %26 = vector.broadcast %25 : vector<1x128xf32> to vector<8x128xf32>
    %27 = arith.addf %23, %26 : vector<8x128xf32>
    %cst_21 = arith.constant 0.000000e+00 : f32
    %28 = vector.broadcast %cst_21 : f32 to vector<8x128xf32>
    %29 = arith.maximumf %27, %28 : vector<8x128xf32>
    %30 = vector.extract_strided_slice %29 {offsets = [0, 0], sizes = [8, 32], strides = [1, 1]} : vector<8x128xf32> to vector<8x32xf32>
    %c3 = arith.constant 3 : index
    %c0_22 = arith.constant 0 : index
    %c0_23 = arith.constant 0 : index
    %31 = vector.load %arg2[%c3, %c0_22, %c0_23] : memref<4x32x128xf32, #tpu.memory_space<vmem>>, vector<1x32x128xf32>
    %32 = vector.shape_cast %31 : vector<1x32x128xf32> to vector<32x128xf32>
    %cst_24 = arith.constant dense<0.000000e+00> : vector<8x128xf32>
    %33 = tpu.matmul %30, %32, %cst_24 {dimension_numbers = #tpu.dot_dimension_numbers<[1], [0], [0], [1], [0, 0, 1, 1], [], []>} : vector<8x32xf32>, vector<32x128xf32>, vector<8x128xf32> -> vector<8x128xf32>
    %c3_25 = arith.constant 3 : index
    %c0_26 = arith.constant 0 : index
    %c0_27 = arith.constant 0 : index
    %34 = vector.load %arg3[%c3_25, %c0_26, %c0_27] : memref<4x1x128xf32, #tpu.memory_space<vmem>>, vector<1x1x128xf32>
    %35 = vector.shape_cast %34 : vector<1x1x128xf32> to vector<1x128xf32>
    %36 = vector.broadcast %35 : vector<1x128xf32> to vector<8x128xf32>
    %37 = arith.addf %33, %36 : vector<8x128xf32>
    %c0_28 = arith.constant 0 : index
    %c0_29 = arith.constant 0 : index
    %38 = vector.load %arg4[%c0_28, %c0_29] : memref<8x128xf32, #tpu.memory_space<vmem>>, vector<8x128xf32>
    tpu.vector_store %arg4[%c0_28, %c0_29], %37 {strides = array<i32>} : memref<8x128xf32, #tpu.memory_space<vmem>>, vector<8x128xf32>,
    return
  }
  func.func @transform_0(%arg0: i32) -> (i32, i32) {
    %c0_i32 = arith.constant 0 : i32
    %c0_i32_0 = arith.constant 0 : i32
    return %arg0, %c0_i32 : i32, i32
  }
  func.func @transform_1(%arg0: i32) -> (i32, i32, i32) {
    %c0_i32 = arith.constant 0 : i32
    %c0_i32_0 = arith.constant 0 : i32
    %c0_i32_1 = arith.constant 0 : i32
    %c0_i32_2 = arith.constant 0 : i32
    return %c0_i32, %c0_i32_0, %c0_i32_1 : i32, i32, i32
  }
  func.func @transform_2(%arg0: i32) -> (i32, i32, i32) {
    %c0_i32 = arith.constant 0 : i32
    %c0_i32_0 = arith.constant 0 : i32
    %c0_i32_1 = arith.constant 0 : i32
    %c0_i32_2 = arith.constant 0 : i32
    return %c0_i32, %c0_i32_0, %c0_i32_1 : i32, i32, i32
  }
  func.func @transform_3(%arg0: i32) -> (i32, i32) {
    %c0_i32 = arith.constant 0 : i32
    %c0_i32_0 = arith.constant 0 : i32
    return %arg0, %c0_i32 : i32, i32
  }
}

</mosaic_0001>

<bundles_post_ra>
// kernel: pw_mlp2_forward.1
= control target key start
LH: loop header
LB: loop body
LE: loop exit
PB: predicated region body
PF: predicated region fallthrough
CT: control target
= control target key end

     0   :  { %8 = vsyncpa [#allocation3], 0  ;;  %s211_s15 = smov [#allocation2]   ;;  %s212_s17 = smov 128   ;;  %s259_s0 = inlined_call_operand.vmem [shape: f32[8,32], index: 0, kind: input, shape index: {}]   ;;  %s260_s1 = inlined_call_operand.hbm [shape: f32[4,32,128], index: 1, kind: input, shape index: {}]   ;;  %s261_s2 = inlined_call_operand.vmem [shape: f32[4,1,128], index: 2, kind: input, shape index: {}]   ;;  %s262_s3 = inlined_call_operand.vmem [shape: f32[8,128], index: 3, kind: output, shape index: {}]  }
   0x1   :  { %s15_s14 = sshll.u32 %s260_s1, 4  ;;  %s17_s16 = sshll.u32 %s211_s15, 4  ;;  %s16_s14 = int_to_ptr.hbm [resolvable:$true] %s15_s14  ;;  %s18_s16 = int_to_ptr.vmem [resolvable:$true] %s17_s16 }
   0x2   :  { %s213_s18 = smov 8  }
   0x3   :  { %23 = dma.hbm_to_vmem [thread:$0]  %s16_s14, 2048, %s18_s16, [#allocation3], %s212_s17, %s212_s17, %s213_s18  }
   0x4   :  { %209 = dma.done.wait [#allocation3], 2048  }
   0x5   :  { %210 = vsyncadd [#allocation3], 4294965248  ;;  %v34_v0 = vld [vmem:[#allocation2 + $0x18] sm:$0xff]  ;;  %v33_v1 = vld [vmem:[#allocation2 + $0x10] sm:$0xff]  ;;  %vm39_vm0 = vcmask 261120  }
   0x6   :  { %55 = vmatpush.msra.mxu0 %v34_v0  ;;  %v68_v2 = vld [vmem:[#allocation2 + $0x38] sm:$0xff]  ;;  %v32_v3 = vld [vmem:[#allocation2 + $0x8] sm:$0xff]  ;;  %v31_v4 = vld [vmem:[#allocation2] sm:$0xff] }
   0x7   :  { %89 = vmatpush.msra.mxu1 %v68_v2  ;;  %v30_v5 = vld [vmem:[%s259_s0] sm:$0xff]  ;;  %v67_v6 = vld [vmem:[#allocation2 + $0x30] sm:$0xff]  ;;  %v66_v7 = vld [vmem:[#allocation2 + $0x28] sm:$0xff] }
   0x8   :  { %56 = vmatpush.msra.mxu0 %v33_v1  ;;  %v65_v8 = vld [vmem:[#allocation2 + $0x20] sm:$0xff]  ;;  %v102_v9 = vld [vmem:[#allocation2 + $0x58] sm:$0xff]  ;;  %v101_v14 = vld [vmem:[#allocation2 + $0x50] sm:$0xff] }
   0x9   :  { %90 = vmatpush.msra.mxu1 %v67_v6  ;;  %123 = vmatpush.msra.mxu2 %v102_v9  ;;  %v181_v10 = vld [vmem:[%s261_s2] ss:$0 sm:$0xff]  ;;  %v100_v15 = vld [vmem:[#allocation2 + $0x48] sm:$0xff]  ;;  %v136_v17 = vld [vmem:[#allocation2 + $0x78] sm:$0xff] }
   0xa   :  { %57 = vmatpush.msra.mxu0 %v32_v3  ;;  %v99_v16 = vld [vmem:[#allocation2 + $0x40] sm:$0xff]  ;;  %157 = vmatpush.msra.mxu3 %v136_v17  ;;  %v135_v22 = vld [vmem:[#allocation2 + $0x70] sm:$0xff]  ;;  %v134_v23 = vld [vmem:[#allocation2 + $0x68] sm:$0xff] }
   0xb   :  { %91 = vmatpush.msra.mxu1 %v66_v7  ;;  %124 = vmatpush.msra.mxu2 %v101_v14  ;;  %v182_v18 = vld [vmem:[%s261_s2 + $0x1] ss:$0 sm:$0xff]  ;;  %v183_v25 = vld [vmem:[%s261_s2 + $0x2] ss:$0 sm:$0xff]  ;;  %v184_v29 = vld [vmem:[%s261_s2 + $0x3] ss:$0 sm:$0xff] }
   0xc   :  { %58 = vmatpush.msra.mxu0 %v31_v4  ;;  %158 = vmatpush.msra.mxu3 %v135_v22  ;;  %v133_v24 = vld [vmem:[#allocation2 + $0x60] sm:$0xff] }
   0xd   :  { %171 = vmatmul.msk.f32.vlgmr.msra.gmra.mxu0 %vm39_vm0, %v30_v5  ;;  %92 = vmatpush.msra.mxu1 %v65_v8 }
   0xe   :  { %125 = vmatpush.msra.mxu2 %v100_v15  ;;  %159 = vmatpush.msra.mxu3 %v134_v23 }
  0x10   :  { %126 = vmatpush.msra.mxu2 %v99_v16  ;;  %160 = vmatpush.msra.mxu3 %v133_v24 }
  0x8a   :  { %v60_v11 = vpop.f32.mrf.mxu0 }
  0x8b   :  { %v61_v12 = vadd.f32 %v181_v10, %v60_v11 }
  0x8d   :  { %v63_v13 = vmax.f32 %v61_v12, 0.0 }
  0x8f   :  { %173 = vmatmul.msk.f32.vlgmr.msra.gmra.mxu1 %vm39_vm0, %v63_v13 }
 0x10c   :  { %v94_v19 = vpop.f32.mrf.mxu1 }
 0x10d   :  { %v95_v20 = vadd.f32 %v182_v18, %v94_v19 }
 0x10f   :  { %v97_v21 = vmax.f32 %v95_v20, 0.0 }
 0x111   :  { %175 = vmatmul.msk.f32.vlgmr.msra.gmra.mxu2 %vm39_vm0, %v97_v21 }
 0x194   :  { %v128_v26 = vpop.f32.mrf.mxu2 }
 0x195   :  { %v129_v27 = vadd.f32 %v183_v25, %v128_v26 }
 0x197   :  { %v131_v28 = vmax.f32 %v129_v27, 0.0 }
 0x199   :  { %177 = vmatmul.msk.f32.vlgmr.msra.gmra.mxu3 %vm39_vm0, %v131_v28 }
 0x21c   :  { %v162_v30 = vpop.f32.mrf.mxu3 }
 0x21d   :  { %v163_v31 = vadd.f32 %v184_v29, %v162_v30 }
 0x21f   :  { %165 = vst [vmem:[%s262_s3] sm:$0xff] %v163_v31 }
 0x220   :  { %170 = vsyncpa [#allocation3], 1 }

</bundles_post_ra>
